<compile_context>
chip_gen: v7x
topology: tpu7x:2x2x1
jax: 0.10.0
libtpu: 0.0.40
codegen_flags: <defaults>
</compile_context>

<pallas_src>
import functools

import jax
import jax.numpy as jnp
from jax.experimental import pallas as pl
from jax.experimental.pallas import tpu as pltpu

NEG_SLOPE = 0.01   # torch.nn.LeakyReLU default
LANE = 128
SUBLANE = 8

# Native MXU dtype on all generations; f32 accumulation is kept via
# preferred_element_type in the kernel.
MATMUL_DTYPE = jnp.bfloat16


def _round_up(x, m):
    return ((x + m - 1) // m) * m


def _leaky_relu(h):
    # mul + max: one VALU op cheaper than the compare+select lowering of where.
    return jnp.maximum(h, NEG_SLOPE * h)


def mlp_kernel(x_ref,
               w1_ref, b1_ref,
               w2_ref, b2_ref,
               w3_ref, b3_ref,
               w4_ref, b4_ref,
               w5_ref, b5_ref,
               o_ref):
    """One batch tile through the whole MLP.

    Weights are already in MATMUL_DTYPE (pre-cast outside the kernel); only the
    activation is cast per dot. Bias add / LeakyReLU happen in f32."""

    def linear(h, w_ref, b_ref):
        acc = jnp.dot(h.astype(MATMUL_DTYPE), w_ref[...],
                      preferred_element_type=jnp.float32)
        return acc + b_ref[...]

    h = x_ref[...]                                      # f32 activations
    h = _leaky_relu(linear(h, w1_ref, b1_ref))
    h = _leaky_relu(linear(h, w2_ref, b2_ref))
    h = _leaky_relu(linear(h, w3_ref, b3_ref))
    h = _leaky_relu(linear(h, w4_ref, b4_ref))
    o_ref[...] = linear(h, w5_ref, b5_ref).astype(o_ref.dtype)


@functools.partial(jax.jit, static_argnames=("tb",))
def mlp_forward(x, padded_params, *, tb=1024):
    """x: [B, obs_size] f32; padded_params: list of (W [in_p, out_p] bf16,
    b [1, out_p] f32).  Returns [B, n_act] f32."""
    B, obs = x.shape

    # Clamp user-passed tile to a multiple of 8 sublanes (correctness) and
    # pick the batch tile.  Sweep tb in 512-2048 for large batches; on v5e
    # keep it <= ~1024 (16 MiB default scoped VMEM, single vst slot).
    tb = max(SUBLANE, (int(tb) // SUBLANE) * SUBLANE)
    B_al = _round_up(B, SUBLANE)
    if B_al <= tb:
        if B_al > SUBLANE:
            # Whole batch fits in one tile: split into 2 grid steps so the
            # "parallel" grid uses both of v7x's TensorCores.
            TB = _round_up(B_al, 2 * SUBLANE) // 2
        else:
            TB = B_al
    else:
        TB = tb
    Bp = _round_up(B, TB)
    if Bp != B:
        x = jnp.pad(x, ((0, Bp - B), (0, 0)))

    flat = []
    for w, b in padded_params:
        flat.extend((w, b))

    hidden_p = padded_params[0][0].shape[1]      # 128
    out_dim = padded_params[-1][0].shape[1]      # n_act (unpadded output)

    # x / out are tiled over the batch grid; weights & biases use a constant
    # index_map so they stay VMEM-resident (DMA'd once, pipelined away).
    in_specs = [pl.BlockSpec((TB, obs), lambda i: (i, 0))]
    for w, b in padded_params:
        in_specs.append(pl.BlockSpec(w.shape, lambda i: (0, 0)))
        in_specs.append(pl.BlockSpec(b.shape, lambda i: (0, 0)))
    out_specs = pl.BlockSpec((TB, out_dim), lambda i: (i, 0))

    n_hidden_layers = len(padded_params) - 2     # 3 hidden->hidden matmuls
    flops = 2 * Bp * (obs * hidden_p
                      + n_hidden_layers * hidden_p * hidden_p
                      + hidden_p * out_dim)
    bytes_accessed = (4 * Bp * obs
                      + sum(a.size * a.dtype.itemsize for a in flat)
                      + 4 * Bp * out_dim)

    out = pl.pallas_call(
        mlp_kernel,
        out_shape=jax.ShapeDtypeStruct((Bp, out_dim), jnp.float32),
        grid=(Bp // TB,),
        in_specs=in_specs,
        out_specs=out_specs,
        compiler_params=pltpu.CompilerParams(
            dimension_semantics=("parallel",)),   # shards across v7x's 2 TCs
        cost_estimate=pl.CostEstimate(
            flops=flops, transcendentals=0, bytes_accessed=bytes_accessed),
    )(x, *flat)

    return out[:B]


def init_mlp_params(key, obs_size, n_act, hidden=100):
    """Logical (unpadded) f32 params mimicking torch.nn.Linear default init
    (U[-1/sqrt(fan_in), 1/sqrt(fan_in)]).  Weights stored as [in, out]."""
    dims = [obs_size, hidden, hidden, hidden, hidden, n_act]
    params = []
    for i in range(len(dims) - 1):
        fan_in, fan_out = dims[i], dims[i + 1]
        key, kw, kb = jax.random.split(key, 3)
        bound = 1.0 / jnp.sqrt(jnp.float32(fan_in))
        w = jax.random.uniform(kw, (fan_in, fan_out), jnp.float32, -bound, bound)
        b = jax.random.uniform(kb, (1, fan_out), jnp.float32, -bound, bound)
        params.append((w, b))
    return params


def pad_params(params):
    """Zero-pad every hidden layer's output (and the matching next-layer input)
    to a multiple of 128 lanes so hidden tiles are lane-dense, and pre-cast
    weights to the MXU dtype (bf16).  The LAST layer's output dim is left
    unpadded (full-extent last dim is a legal block) so the output writeback
    carries only the n_act real columns.  Biases stay f32 (added to the f32
    accumulator)."""
    padded = []
    n_layers = len(params)
    for li, (w, b) in enumerate(params):
        fan_in, fan_out = w.shape
        in_p = fan_in if li == 0 else _round_up(fan_in, LANE)
        out_p = fan_out if li == n_layers - 1 else _round_up(fan_out, LANE)
        wp = jnp.zeros((in_p, out_p), jnp.float32).at[:fan_in, :fan_out].set(w)
        bp = jnp.zeros((1, out_p), jnp.float32).at[:, :fan_out].set(b)
        padded.append((wp.astype(MATMUL_DTYPE), bp))
    return padded


def mlp_reference(x, params):
    """Pure-JAX f32 reference on the unpadded params."""
    h = x
    for i, (w, b) in enumerate(params):
        h = h @ w + b
        if i < len(params) - 1:
            h = jnp.where(h > 0, h, NEG_SLOPE * h)
    return h


if __name__ == "__main__":
    key = jax.random.PRNGKey(0)
    k_x, k_p = jax.random.split(key)

    batch, obs_size, n_act = 8, 32, 4
    x = jax.random.normal(k_x, (batch, obs_size), jnp.float32)

    params = init_mlp_params(k_p, obs_size, n_act)
    padded = pad_params(params)

    out = mlp_forward(x, padded)
    out = jax.block_until_ready(out)

    ref = mlp_reference(x, params)
    assert out.shape == (batch, n_act), out.shape
    # bf16 matmul operands (f32 accumulation) -> loosened tolerance vs f32 ref.
    assert jnp.allclose(out, ref, atol=5e-2, rtol=5e-2), (
        f"max abs err = {jnp.max(jnp.abs(out - ref))}")

    print("KERNEL_OK")
</pallas_src>

<mosaic_0001>
module attributes {stable_mosaic.version = 11 : i64} {
  func.func @mlp_kernel(%arg0: i32, %arg1: memref<8x32xf32, #tpu.memory_space<vmem>>, %arg2: memref<32x128xbf16, #tpu.memory_space<vmem>>, %arg3: memref<1x128xf32, #tpu.memory_space<vmem>>, %arg4: memref<128x128xbf16, #tpu.memory_space<vmem>>, %arg5: memref<1x128xf32, #tpu.memory_space<vmem>>, %arg6: memref<128x128xbf16, #tpu.memory_space<vmem>>, %arg7: memref<1x128xf32, #tpu.memory_space<vmem>>, %arg8: memref<128x128xbf16, #tpu.memory_space<vmem>>, %arg9: memref<1x128xf32, #tpu.memory_space<vmem>>, %arg10: memref<128x4xbf16, #tpu.memory_space<vmem>>, %arg11: memref<1x4xf32, #tpu.memory_space<vmem>>, %arg12: memref<8x4xf32, #tpu.memory_space<vmem>>) attributes {dimension_semantics = [#tpu.dimension_semantics<parallel>], iteration_bounds = array<i64: 1>, scalar_prefetch = 0 : i64, scratch_operands = 0 : i64, tpu.core_type = #tpu.core_type<tc>, window_params = [{transform_indices = @transform_0, window_bounds = array<i64: 8, 32>}, {pipeline_mode = #tpu.pipeline_mode<synchronous>, transform_indices = @transform_1, window_bounds = array<i64: 32, 128>}, {pipeline_mode = #tpu.pipeline_mode<synchronous>, transform_indices = @transform_2, window_bounds = array<i64: 1, 128>}, {pipeline_mode = #tpu.pipeline_mode<synchronous>, transform_indices = @transform_3, window_bounds = array<i64: 128, 128>}, {pipeline_mode = #tpu.pipeline_mode<synchronous>, transform_indices = @transform_4, window_bounds = array<i64: 1, 128>}, {pipeline_mode = #tpu.pipeline_mode<synchronous>, transform_indices = @transform_5, window_bounds = array<i64: 128, 128>}, {pipeline_mode = #tpu.pipeline_mode<synchronous>, transform_indices = @transform_6, window_bounds = array<i64: 1, 128>}, {pipeline_mode = #tpu.pipeline_mode<synchronous>, transform_indices = @transform_7, window_bounds = array<i64: 128, 128>}, {pipeline_mode = #tpu.pipeline_mode<synchronous>, transform_indices = @transform_8, window_bounds = array<i64: 1, 128>}, {pipeline_mode = #tpu.pipeline_mode<synchronous>, transform_indices = @transform_9, window_bounds = array<i64: 128, 4>}, {pipeline_mode = #tpu.pipeline_mode<synchronous>, transform_indices = @transform_10, window_bounds = array<i64: 1, 4>}, {transform_indices = @transform_11, window_bounds = array<i64: 8, 4>}]} {
    %c0 = arith.constant 0 : index
    %c0_0 = arith.constant 0 : index
    %0 = vector.load %arg1[%c0, %c0_0] : memref<8x32xf32, #tpu.memory_space<vmem>>, vector<8x32xf32>
    %1 = arith.truncf %0 : vector<8x32xf32> to vector<8x32xbf16>
    %c0_1 = arith.constant 0 : index
    %c0_2 = arith.constant 0 : index
    %2 = vector.load %arg2[%c0_1, %c0_2] : memref<32x128xbf16, #tpu.memory_space<vmem>>, vector<32x128xbf16>
    %cst = arith.constant dense<0.000000e+00> : vector<8x128xf32>
    %3 = tpu.matmul %1, %2, %cst {dimension_numbers = #tpu.dot_dimension_numbers<[1], [0], [0], [1], [0, 0, 1, 1], [], []>} : vector<8x32xbf16>, vector<32x128xbf16>, vector<8x128xf32> -> vector<8x128xf32>
    %c0_3 = arith.constant 0 : index
    %c0_4 = arith.constant 0 : index
    %4 = vector.load %arg3[%c0_3, %c0_4] : memref<1x128xf32, #tpu.memory_space<vmem>>, vector<1x128xf32>
    %5 = vector.broadcast %4 : vector<1x128xf32> to vector<8x128xf32>
    %6 = arith.addf %3, %5 : vector<8x128xf32>
    %cst_5 = arith.constant 0.00999999977 : f32
    %7 = vector.broadcast %cst_5 : f32 to vector<8x128xf32>
    %8 = arith.mulf %7, %6 : vector<8x128xf32>
    %9 = arith.maximumf %6, %8 : vector<8x128xf32>
    %10 = arith.truncf %9 : vector<8x128xf32> to vector<8x128xbf16>
    %c0_6 = arith.constant 0 : index
    %c0_7 = arith.constant 0 : index
    %11 = vector.load %arg4[%c0_6, %c0_7] : memref<128x128xbf16, #tpu.memory_space<vmem>>, vector<128x128xbf16>
    %cst_8 = arith.constant dense<0.000000e+00> : vector<8x128xf32>
    %12 = tpu.matmul %10, %11, %cst_8 {dimension_numbers = #tpu.dot_dimension_numbers<[1], [0], [0], [1], [0, 0, 1, 1], [], []>} : vector<8x128xbf16>, vector<128x128xbf16>, vector<8x128xf32> -> vector<8x128xf32>
    %c0_9 = arith.constant 0 : index
    %c0_10 = arith.constant 0 : index
    %13 = vector.load %arg5[%c0_9, %c0_10] : memref<1x128xf32, #tpu.memory_space<vmem>>, vector<1x128xf32>
    %14 = vector.broadcast %13 : vector<1x128xf32> to vector<8x128xf32>
    %15 = arith.addf %12, %14 : vector<8x128xf32>
    %cst_11 = arith.constant 0.00999999977 : f32
    %16 = vector.broadcast %cst_11 : f32 to vector<8x128xf32>
    %17 = arith.mulf %16, %15 : vector<8x128xf32>
    %18 = arith.maximumf %15, %17 : vector<8x128xf32>
    %19 = arith.truncf %18 : vector<8x128xf32> to vector<8x128xbf16>
    %c0_12 = arith.constant 0 : index
    %c0_13 = arith.constant 0 : index
    %20 = vector.load %arg6[%c0_12, %c0_13] : memref<128x128xbf16, #tpu.memory_space<vmem>>, vector<128x128xbf16>
    %cst_14 = arith.constant dense<0.000000e+00> : vector<8x128xf32>
    %21 = tpu.matmul %19, %20, %cst_14 {dimension_numbers = #tpu.dot_dimension_numbers<[1], [0], [0], [1], [0, 0, 1, 1], [], []>} : vector<8x128xbf16>, vector<128x128xbf16>, vector<8x128xf32> -> vector<8x128xf32>
    %c0_15 = arith.constant 0 : index
    %c0_16 = arith.constant 0 : index
    %22 = vector.load %arg7[%c0_15, %c0_16] : memref<1x128xf32, #tpu.memory_space<vmem>>, vector<1x128xf32>
    %23 = vector.broadcast %22 : vector<1x128xf32> to vector<8x128xf32>
    %24 = arith.addf %21, %23 : vector<8x128xf32>
    %cst_17 = arith.constant 0.00999999977 : f32
    %25 = vector.broadcast %cst_17 : f32 to vector<8x128xf32>
    %26 = arith.mulf %25, %24 : vector<8x128xf32>
    %27 = arith.maximumf %24, %26 : vector<8x128xf32>
    %28 = arith.truncf %27 : vector<8x128xf32> to vector<8x128xbf16>
    %c0_18 = arith.constant 0 : index
    %c0_19 = arith.constant 0 : index
    %29 = vector.load %arg8[%c0_18, %c0_19] : memref<128x128xbf16, #tpu.memory_space<vmem>>, vector<128x128xbf16>
    %cst_20 = arith.constant dense<0.000000e+00> : vector<8x128xf32>
    %30 = tpu.matmul %28, %29, %cst_20 {dimension_numbers = #tpu.dot_dimension_numbers<[1], [0], [0], [1], [0, 0, 1, 1], [], []>} : vector<8x128xbf16>, vector<128x128xbf16>, vector<8x128xf32> -> vector<8x128xf32>
    %c0_21 = arith.constant 0 : index
    %c0_22 = arith.constant 0 : index
    %31 = vector.load %arg9[%c0_21, %c0_22] : memref<1x128xf32, #tpu.memory_space<vmem>>, vector<1x128xf32>
    %32 = vector.broadcast %31 : vector<1x128xf32> to vector<8x128xf32>
    %33 = arith.addf %30, %32 : vector<8x128xf32>
    %cst_23 = arith.constant 0.00999999977 : f32
    %34 = vector.broadcast %cst_23 : f32 to vector<8x128xf32>
    %35 = arith.mulf %34, %33 : vector<8x128xf32>
    %36 = arith.maximumf %33, %35 : vector<8x128xf32>
    %37 = arith.truncf %36 : vector<8x128xf32> to vector<8x128xbf16>
    %c0_24 = arith.constant 0 : index
    %c0_25 = arith.constant 0 : index
    %38 = vector.load %arg10[%c0_24, %c0_25] : memref<128x4xbf16, #tpu.memory_space<vmem>>, vector<128x4xbf16>
    %cst_26 = arith.constant dense<0.000000e+00> : vector<8x4xf32>
    %39 = tpu.matmul %37, %38, %cst_26 {dimension_numbers = #tpu.dot_dimension_numbers<[1], [0], [0], [1], [0, 0, 1, 1], [], []>} : vector<8x128xbf16>, vector<128x4xbf16>, vector<8x4xf32> -> vector<8x4xf32>
    %c0_27 = arith.constant 0 : index
    %c0_28 = arith.constant 0 : index
    %40 = vector.load %arg11[%c0_27, %c0_28] : memref<1x4xf32, #tpu.memory_space<vmem>>, vector<1x4xf32>
    %41 = vector.broadcast %40 : vector<1x4xf32> to vector<8x4xf32>
    %42 = arith.addf %39, %41 : vector<8x4xf32>
    %c0_29 = arith.constant 0 : index
    %c0_30 = arith.constant 0 : index
    %43 = vector.load %arg12[%c0_29, %c0_30] : memref<8x4xf32, #tpu.memory_space<vmem>>, vector<8x4xf32>
    tpu.vector_store %arg12[%c0_29, %c0_30], %42 {strides = array<i32>} : memref<8x4xf32, #tpu.memory_space<vmem>>, vector<8x4xf32>,
    return
  }
  func.func @transform_0(%arg0: i32) -> (i32, i32) {
    %c0_i32 = arith.constant 0 : i32
    %c0_i32_0 = arith.constant 0 : i32
    return %arg0, %c0_i32 : i32, i32
  }
  func.func @transform_1(%arg0: i32) -> (i32, i32) {
    %c0_i32 = arith.constant 0 : i32
    %c0_i32_0 = arith.constant 0 : i32
    %c0_i32_1 = arith.constant 0 : i32
    return %c0_i32, %c0_i32_0 : i32, i32
  }
  func.func @transform_2(%arg0: i32) -> (i32, i32) {
    %c0_i32 = arith.constant 0 : i32
    %c0_i32_0 = arith.constant 0 : i32
    %c0_i32_1 = arith.constant 0 : i32
    return %c0_i32, %c0_i32_0 : i32, i32
  }
  func.func @transform_3(%arg0: i32) -> (i32, i32) {
    %c0_i32 = arith.constant 0 : i32
    %c0_i32_0 = arith.constant 0 : i32
    %c0_i32_1 = arith.constant 0 : i32
    return %c0_i32, %c0_i32_0 : i32, i32
  }
  func.func @transform_4(%arg0: i32) -> (i32, i32) {
    %c0_i32 = arith.constant 0 : i32
    %c0_i32_0 = arith.constant 0 : i32
    %c0_i32_1 = arith.constant 0 : i32
    return %c0_i32, %c0_i32_0 : i32, i32
  }
  func.func @transform_5(%arg0: i32) -> (i32, i32) {
    %c0_i32 = arith.constant 0 : i32
    %c0_i32_0 = arith.constant 0 : i32
    %c0_i32_1 = arith.constant 0 : i32
    return %c0_i32, %c0_i32_0 : i32, i32
  }
  func.func @transform_6(%arg0: i32) -> (i32, i32) {
    %c0_i32 = arith.constant 0 : i32
    %c0_i32_0 = arith.constant 0 : i32
    %c0_i32_1 = arith.constant 0 : i32
    return %c0_i32, %c0_i32_0 : i32, i32
  }
  func.func @transform_7(%arg0: i32) -> (i32, i32) {
    %c0_i32 = arith.constant 0 : i32
    %c0_i32_0 = arith.constant 0 : i32
    %c0_i32_1 = arith.constant 0 : i32
    return %c0_i32, %c0_i32_0 : i32, i32
  }
  func.func @transform_8(%arg0: i32) -> (i32, i32) {
    %c0_i32 = arith.constant 0 : i32
    %c0_i32_0 = arith.constant 0 : i32
    %c0_i32_1 = arith.constant 0 : i32
    return %c0_i32, %c0_i32_0 : i32, i32
  }
  func.func @transform_9(%arg0: i32) -> (i32, i32) {
    %c0_i32 = arith.constant 0 : i32
    %c0_i32_0 = arith.constant 0 : i32
    %c0_i32_1 = arith.constant 0 : i32
    return %c0_i32, %c0_i32_0 : i32, i32
  }
  func.func @transform_10(%arg0: i32) -> (i32, i32) {
    %c0_i32 = arith.constant 0 : i32
    %c0_i32_0 = arith.constant 0 : i32
    %c0_i32_1 = arith.constant 0 : i32
    return %c0_i32, %c0_i32_0 : i32, i32
  }
  func.func @transform_11(%arg0: i32) -> (i32, i32) {
    %c0_i32 = arith.constant 0 : i32
    %c0_i32_0 = arith.constant 0 : i32
    return %arg0, %c0_i32 : i32, i32
  }
}

</mosaic_0001>

<bundles_post_ra>
// kernel: mlp_forward.1
= control target key start
LH: loop header
LB: loop body
LE: loop exit
PB: predicated region body
PF: predicated region fallthrough
CT: control target
= control target key end

     0   :  { %16 = vsyncpa [#allocation3], 0  ;;  %s1123_s0 = inlined_call_operand.vmem [shape: f32[8,32], index: 0, kind: input, shape index: {}]   ;;  %s1124_s1 = inlined_call_operand.hbm [shape: bf16[32,128], index: 1, kind: input, shape index: {}]   ;;  %s1125_s2 = inlined_call_operand.vmem [shape: f32[1,128], index: 2, kind: input, shape index: {}]   ;;  %s1126_s3 = inlined_call_operand.vmem [shape: bf16[128,128], index: 3, kind: input, shape index: {}]   ;;  %s1127_s4 = inlined_call_operand.vmem [shape: f32[1,128], index: 4, kind: input, shape index: {}]   ;;  %s1128_s5 = inlined_call_operand.hbm [shape: bf16[128,128], index: 5, kind: input, shape index: {}]   ;;  %s1129_s6 = inlined_call_operand.vmem [shape: f32[1,128], index: 6, kind: input, shape index: {}]   ;;  %s1130_s7 = inlined_call_operand.hbm [shape: bf16[128,128], index: 7, kind: input, shape index: {}]   ;;  %s1131_s8 = inlined_call_operand.vmem [shape: f32[1,128], index: 8, kind: input, shape index: {}]   ;;  %s1132_s9 = inlined_call_operand.vmem [shape: bf16[128,4], index: 9, kind: input, shape index: {}]   ;;  %s1133_s10 = inlined_call_operand.vmem [shape: f32[1,4], index: 10, kind: input, shape index: {}]   ;;  %s1134_s11 = inlined_call_operand.vmem [shape: f32[8,4], index: 11, kind: output, shape index: {}]  }
   0x1   :  { %17 = vsyncpa [#allocation5], 0  ;;  %s891_s17 = smov [#allocation4]   ;;  %s892_s19 = smov [#allocation2]  }
   0x2   :  { %s43_s18 = sshll.u32 %s891_s17, 4  ;;  %s25_s20 = sshll.u32 %s892_s19, 4  ;;  %s44_s18 = int_to_ptr.vmem [resolvable:$true] %s43_s18  ;;  %s958_s20 = int_to_ptr.vmem [resolvable:$true] %s25_s20 }
   0x3   :  { %s821_s23 = scalar_lea.hbm %s1128_s5, 1024 }
   0x4   :  { %p822_p0 = scmp.ne.s32.totalorder %s1128_s5, %s821_s23  ;;  %p825_p1 = scmp.lt.u32.totalorder %s821_s23, %s1128_s5 }
   0x6   :  { %p827_p2 = pnand %p825_p1, %p822_p0 }
   0x8   :  { %830 = shalt.err (!%p827_p2)
}
   0x9   :  { %s831_s28 = scalar_lea.vmem %s44_s18, 1024  ;;  %p836_p4 = scmp.lt.s32.totalorder %s44_s18, %s44_s18 }
   0xa   :  { %p832_p3 = scmp.ne.s32.totalorder %s44_s18, %s831_s28  ;;  %p837_p5 = scmp.lt.s32.totalorder %s831_s28, %s831_s28 }
   0xc   :  { %p838_p6 = por %p837_p5, %p836_p4 }
   0xe   :  { %p839_p7 = pnand %p838_p6, %p832_p3 }
  0x10   :  { %842 = shalt.err (!%p839_p7)
}
  0x11   :  { %s893_s29 = smov 64   ;;  %s894_s30 = smov 4  }
  0x12   :  { %49 = dma.hbm_to_vmem [thread:$0]  %s1128_s5, 1024, %s44_s18, [#allocation5], %s893_s29, %s893_s29, %s894_s30  }
  0x13   :  { %s843_s16 = scalar_lea.hbm %s1124_s1, 256 }
  0x14   :  { %p844_p8 = scmp.ne.s32.totalorder %s1124_s1, %s843_s16  ;;  %p847_p9 = scmp.lt.u32.totalorder %s843_s16, %s1124_s1 }
  0x16   :  { %p849_p10 = pnand %p847_p9, %p844_p8 }
  0x18   :  { %852 = shalt.err (!%p849_p10)
}
  0x19   :  { %s853_s23 = scalar_lea.vmem %s958_s20, 256  ;;  %p858_p12 = scmp.lt.s32.totalorder %s958_s20, %s958_s20 }
  0x1a   :  { %p854_p11 = scmp.ne.s32.totalorder %s958_s20, %s853_s23  ;;  %p859_p13 = scmp.lt.s32.totalorder %s853_s23, %s853_s23 }
  0x1c   :  { %p860_p0 = por %p859_p13, %p858_p12 }
  0x1e   :  { %p861_p1 = pnand %p860_p0, %p854_p11 }
  0x20   :  { %864 = shalt.err (!%p861_p1)
}
  0x21   :  { %31 = dma.hbm_to_vmem [thread:$0]  %s1124_s1, 256, %s958_s20, [#allocation3], %s893_s29, %s893_s29, %s894_s30  }
  0x22   :  { %s895_s24 = smov [#allocation6]   ;;  %s865_s28 = scalar_lea.hbm %s1130_s7, 1024 }
  0x23   :  { %s57_s25 = sshll.u32 %s895_s24, 4  ;;  %p866_p2 = scmp.ne.s32.totalorder %s1130_s7, %s865_s28  ;;  %s58_s25 = int_to_ptr.vmem [resolvable:$true] %s57_s25 }
  0x24   :  { %p869_p3 = scmp.lt.u32.totalorder %s865_s28, %s1130_s7 }
  0x26   :  { %p871_p4 = pnand %p869_p3, %p866_p2 }
  0x28   :  { %874 = shalt.err (!%p871_p4)
}
  0x29   :  { %s875_s16 = scalar_lea.vmem %s58_s25, 1024  ;;  %p880_p6 = scmp.lt.s32.totalorder %s58_s25, %s58_s25 }
  0x2a   :  { %p876_p5 = scmp.ne.s32.totalorder %s58_s25, %s875_s16  ;;  %p881_p7 = scmp.lt.s32.totalorder %s875_s16, %s875_s16 }
  0x2c   :  { %p882_p8 = por %p881_p7, %p880_p6 }
  0x2e   :  { %p883_p9 = pnand %p882_p8, %p876_p5 }
  0x30   :  { %886 = shalt.err (!%p883_p9)
}
  0x31   :  { %63 = dma.hbm_to_vmem [thread:$0]  %s1130_s7, 1024, %s58_s25, [#allocation5], %s893_s29, %s893_s29, %s894_s30  }
  0x32   :  { %887 = dma.done.wait [#allocation3], 256  }
  0x33   :  { %888 = vsyncadd [#allocation3], 4294967040 }
  0x34   :  { %889 = dma.done.wait [#allocation5], 2048  }
  0x35   :  { %890 = vsyncadd [#allocation5], 4294965248  ;;  %v896_v0 = vmov 0.0   ;;  %vm897_vm0 = vmmov 0   ;;  %v787_v1 = vld [vmem:[#allocation2] sm:$0xff]   ;;  %v788_v2 = vld [vmem:[#allocation2 + $0x8] sm:$0xff]  }
  0x36   :  { %692 = vmatprep.subr.bf16.mxu0 %v896_v0  ;;  %696 = vmatprep.mubr.msk.bf16.mxu0 %vm897_vm0, %v896_v0  ;;  %v80_v3 = vld [vmem:[%s1123_s0] sm:$0xff]  ;;  %v790_v6 = vld [vmem:[%s1126_s3 + $0x8] sm:$0xff]   ;;  %vm105_vm1 = vcmask 261120   ;;  %v791_v7 = vld [vmem:[%s1126_s3 + $0x10] sm:$0xff]   ;;  %vm605_vm2 = vcmask 31744  }
  0x37   :  { %700 = vmatprep.subr.bf16.mxu1 %v896_v0  ;;  %716 = vmatprep.mubr.msk.bf16.mxu1 %vm897_vm0, %v896_v0  ;;  %v789_v4 = vld [vmem:[%s1126_s3] sm:$0xff]   ;;  %v81_v5 = vpack.c.bf16 %v80_v3, %v80_v3  ;;  %v792_v8 = vld [vmem:[%s1126_s3 + $0x18] sm:$0xff]   ;;  %v794_v10 = vld [vmem:[%s1126_s3 + $0x28] sm:$0xff]  }
  0x38   :  { %693 = vmatpush3.bf16.msra.mxu0 %v787_v1  ;;  %701 = vmatpush3.bf16.msra.mxu1 %v789_v4  ;;  %v793_v9 = vld [vmem:[%s1126_s3 + $0x20] sm:$0xff]   ;;  %v795_v11 = vld [vmem:[%s1126_s3 + $0x30] sm:$0xff]   ;;  %v796_v12 = vld [vmem:[%s1126_s3 + $0x38] sm:$0xff]  }
  0x39   :  { %694 = vmatprep.subr.bf16.mxu0 %v896_v0  ;;  %702 = vmatprep.subr.bf16.mxu1 %v896_v0  ;;  %v797_v13 = vld [vmem:[#allocation4] sm:$0xff]   ;;  %v798_v14 = vld [vmem:[#allocation4 + $0x8] sm:$0xff]   ;;  %v799_v15 = vld [vmem:[#allocation4 + $0x10] sm:$0xff]  }
  0x3a   :  { %v800_v16 = vld [vmem:[#allocation4 + $0x18] sm:$0xff]   ;;  %v801_v17 = vld [vmem:[#allocation4 + $0x20] sm:$0xff]   ;;  %v802_v18 = vld [vmem:[#allocation4 + $0x28] sm:$0xff]  }
  0x3b   :  { %v613_v19 = vld [vmem:[%s1125_s2] ss:$0 sm:$0xff]  ;;  %v804_v29 = vld [vmem:[#allocation4 + $0x38] sm:$0xff]   ;;  %v805_v30 = vld [vmem:[#allocation6] sm:$0xff]  }
  0x3c   :  { %695 = vmatpush3.bf16.msra.mxu0 %v788_v2  ;;  %703 = vmatpush3.bf16.msra.mxu1 %v790_v6  ;;  %v803_v28 = vld [vmem:[#allocation4 + $0x30] sm:$0xff]   ;;  %v806_v31 = vld [vmem:[#allocation6 + $0x8] sm:$0xff]   ;;  %v808_v33 = vld [vmem:[#allocation6 + $0x18] sm:$0xff]  }
  0x3d   :  { %720 = vmatprep.subr.bf16.mxu0 %v896_v0  ;;  %704 = vmatprep.subr.bf16.mxu1 %v896_v0  ;;  %v807_v32 = vld [vmem:[#allocation6 + $0x10] sm:$0xff]   ;;  %v809_v34 = vld [vmem:[#allocation6 + $0x20] sm:$0xff]   ;;  %v810_v35 = vld [vmem:[#allocation6 + $0x28] sm:$0xff]  }
  0x3e   :  { %v617_v36 = vld [vmem:[%s1127_s4] ss:$0 sm:$0xff]  ;;  %v812_v46 = vld [vmem:[#allocation6 + $0x38] sm:$0xff]   ;;  %v815_v49 = vld [vmem:[%s1132_s9 + $0x10] sm:$0xff]  }
  0x3f   :  { %697 = vmatmul.mubr.msk.bf16.vlgmr.msra.gmra.mrb[0].mxu0 %vm105_vm1, %v81_v5  ;;  %v811_v45 = vld [vmem:[#allocation6 + $0x30] sm:$0xff]   ;;  %v814_v48 = vld [vmem:[%s1132_s9 + $0x8] sm:$0xff]   ;;  %v816_v50 = vld [vmem:[%s1132_s9 + $0x18] sm:$0xff]  }
  0x40   :  { %736 = vmatprep.mubr.msk.bf16.mxu0 %vm897_vm0, %v896_v0  ;;  %705 = vmatpush3.bf16.msra.mxu1 %v791_v7  ;;  %v813_v47 = vld [vmem:[%s1132_s9] sm:$0xff]   ;;  %v818_v52 = vld [vmem:[%s1132_s9 + $0x28] sm:$0xff]   ;;  %v819_v62 = vld [vmem:[%s1132_s9 + $0x30] sm:$0xff]  }
  0x41   :  { %706 = vmatprep.subr.bf16.mxu1 %v896_v0  ;;  %721 = vmatpush3.bf16.msra.mxu0 %v797_v13  ;;  %v817_v51 = vld [vmem:[%s1132_s9 + $0x20] sm:$0xff]   ;;  %v820_v63 = vld [vmem:[%s1132_s9 + $0x38] sm:$0xff]  }
  0x42   :  { %722 = vmatprep.subr.bf16.mxu0 %v896_v0  ;;  %v626_v53 = vld [vmem:[%s1129_s6] ss:$0 sm:$0xff] }
  0x43   :  { %v635_v1 = vld [vmem:[%s1131_s8] ss:$0 sm:$0xff] }
  0x44   :  { %707 = vmatpush3.bf16.msra.mxu1 %v792_v8 }
  0x45   :  { %708 = vmatprep.subr.bf16.mxu1 %v896_v0  ;;  %723 = vmatpush3.bf16.msra.mxu0 %v798_v14 }
  0x46   :  { %724 = vmatprep.subr.bf16.mxu0 %v896_v0 }
  0x48   :  { %709 = vmatpush3.bf16.msra.mxu1 %v793_v9 }
  0x49   :  { %710 = vmatprep.subr.bf16.mxu1 %v896_v0  ;;  %725 = vmatpush3.bf16.msra.mxu0 %v799_v15 }
  0x4a   :  { %726 = vmatprep.subr.bf16.mxu0 %v896_v0 }
  0x4c   :  { %711 = vmatpush3.bf16.msra.mxu1 %v794_v10 }
  0x4d   :  { %712 = vmatprep.subr.bf16.mxu1 %v896_v0  ;;  %727 = vmatpush3.bf16.msra.mxu0 %v800_v16 }
  0x4e   :  { %728 = vmatprep.subr.bf16.mxu0 %v896_v0 }
  0x50   :  { %713 = vmatpush3.bf16.msra.mxu1 %v795_v11 }
  0x51   :  { %714 = vmatprep.subr.bf16.mxu1 %v896_v0  ;;  %729 = vmatpush3.bf16.msra.mxu0 %v801_v17 }
  0x52   :  { %730 = vmatprep.subr.bf16.mxu0 %v896_v0 }
  0x54   :  { %715 = vmatpush3.bf16.msra.mxu1 %v796_v12 }
  0x55   :  { %740 = vmatprep.subr.bf16.mxu1 %v896_v0  ;;  %731 = vmatpush3.bf16.msra.mxu0 %v802_v18 }
  0x56   :  { %732 = vmatprep.subr.bf16.mxu0 %v896_v0 }
  0x59   :  { %733 = vmatpush3.bf16.msra.mxu0 %v803_v28 }
  0x5a   :  { %734 = vmatprep.subr.bf16.mxu0 %v896_v0 }
  0x5d   :  { %735 = vmatpush3.bf16.msra.mxu0 %v804_v29 }
  0x5e   :  { %760 = vmatprep.subr.bf16.mxu0 %v896_v0 }
 0x112   :  { %v143_v20 = vpop.f32.mrb[0].mxu0 }
 0x113   :  { %v144_v21 = vadd.f32 %v613_v19, %v143_v20  ;;  %v698_v22 = vpop.f32.mrb[1].mxu0 }
 0x114   :  { %v146_v23 = vpop.f32.mrb[2].mxu0 }
 0x115   :  { %v149_v24 = vmul.f32 0.01, %v144_v21  ;;  %v699_v25 = vpop.f32.mrb[3].mxu0 }
 0x117   :  { %v150_v26 = vmax.f32 %v144_v21, %v149_v24 }
 0x119   :  { %v151_v27 = vpack.c.bf16 %v150_v26, %v150_v26 }
 0x11b   :  { %717 = vmatmul.mubr.bf16.vlgmr.msra.gmra.mrb[0].mxu1 %v151_v27 }
 0x11c   :  { %756 = vmatprep.mubr.msk.bf16.mxu1 %vm897_vm0, %v896_v0  ;;  %741 = vmatpush3.bf16.msra.mxu1 %v805_v30 }
 0x11d   :  { %742 = vmatprep.subr.bf16.mxu1 %v896_v0 }
 0x120   :  { %743 = vmatpush3.bf16.msra.mxu1 %v806_v31 }
 0x121   :  { %744 = vmatprep.subr.bf16.mxu1 %v896_v0 }
 0x124   :  { %745 = vmatpush3.bf16.msra.mxu1 %v807_v32 }
 0x125   :  { %746 = vmatprep.subr.bf16.mxu1 %v896_v0 }
 0x128   :  { %747 = vmatpush3.bf16.msra.mxu1 %v808_v33 }
 0x129   :  { %748 = vmatprep.subr.bf16.mxu1 %v896_v0 }
 0x12c   :  { %749 = vmatpush3.bf16.msra.mxu1 %v809_v34 }
 0x12d   :  { %750 = vmatprep.subr.bf16.mxu1 %v896_v0 }
 0x130   :  { %751 = vmatpush3.bf16.msra.mxu1 %v810_v35 }
 0x131   :  { %752 = vmatprep.subr.bf16.mxu1 %v896_v0 }
 0x134   :  { %753 = vmatpush3.bf16.msra.mxu1 %v811_v45 }
 0x135   :  { %754 = vmatprep.subr.bf16.mxu1 %v896_v0 }
 0x138   :  { %755 = vmatpush3.bf16.msra.mxu1 %v812_v46 }
 0x1ee   :  { %v257_v37 = vpop.f32.mrb[0].mxu1 }
 0x1ef   :  { %v258_v38 = vadd.f32 %v617_v36, %v257_v37  ;;  %v718_v39 = vpop.f32.mrb[1].mxu1 }
 0x1f0   :  { %v260_v40 = vpop.f32.mrb[2].mxu1 }
 0x1f1   :  { %v263_v41 = vmul.f32 0.01, %v258_v38  ;;  %v719_v42 = vpop.f32.mrb[3].mxu1 }
 0x1f3   :  { %v264_v43 = vmax.f32 %v258_v38, %v263_v41 }
 0x1f5   :  { %v265_v44 = vpack.c.bf16 %v264_v43, %v264_v43 }
 0x1f7   :  { %737 = vmatmul.mubr.bf16.vlgmr.msra.gmra.mrb[4].mxu0 %v265_v44 }
 0x1f8   :  { %776 = vmatprep.mubr.msk.bf16.mxu0 %vm897_vm0, %v896_v0  ;;  %761 = vmatpush3.bf16.msra.mxu0 %v813_v47 }
 0x1f9   :  { %762 = vmatprep.subr.bf16.mxu0 %v896_v0 }
 0x1fc   :  { %763 = vmatpush3.bf16.msra.mxu0 %v814_v48 }
 0x1fd   :  { %764 = vmatprep.subr.bf16.mxu0 %v896_v0 }
 0x200   :  { %765 = vmatpush3.bf16.msra.mxu0 %v815_v49 }
 0x201   :  { %766 = vmatprep.subr.bf16.mxu0 %v896_v0 }
 0x204   :  { %767 = vmatpush3.bf16.msra.mxu0 %v816_v50 }
 0x205   :  { %768 = vmatprep.subr.bf16.mxu0 %v896_v0 }
 0x208   :  { %769 = vmatpush3.bf16.msra.mxu0 %v817_v51 }
 0x209   :  { %770 = vmatprep.subr.bf16.mxu0 %v896_v0 }
 0x20c   :  { %771 = vmatpush3.bf16.msra.mxu0 %v818_v52 }
 0x20d   :  { %772 = vmatprep.subr.bf16.mxu0 %v896_v0 }
 0x210   :  { %773 = vmatpush3.bf16.msra.mxu0 %v819_v62 }
 0x211   :  { %774 = vmatprep.subr.bf16.mxu0 %v896_v0  ;;  %v644_v0 = vld [vmem:[%s1133_s10] ss:$0 sm:$0xff] }
 0x214   :  { %775 = vmatpush3.bf16.msra.mxu0 %v820_v63 }
 0x2ca   :  { %v371_v54 = vpop.f32.mrb[4].mxu0 }
 0x2cb   :  { %v372_v55 = vadd.f32 %v626_v53, %v371_v54  ;;  %v738_v56 = vpop.f32.mrb[5].mxu0 }
 0x2cc   :  { %v374_v57 = vpop.f32.mrb[6].mxu0 }
 0x2cd   :  { %v377_v58 = vmul.f32 0.01, %v372_v55  ;;  %v739_v59 = vpop.f32.mrb[7].mxu0 }
 0x2cf   :  { %v378_v60 = vmax.f32 %v372_v55, %v377_v58 }
 0x2d1   :  { %v379_v61 = vpack.c.bf16 %v378_v60, %v378_v60 }
 0x2d3   :  { %757 = vmatmul.mubr.bf16.vlgmr.msra.gmra.mrb[4].mxu1 %v379_v61 }
 0x3a6   :  { %v485_v2 = vpop.f32.mrb[4].mxu1 }
 0x3a7   :  { %v486_v3 = vadd.f32 %v635_v1, %v485_v2  ;;  %v758_v4 = vpop.f32.mrb[5].mxu1 }
 0x3a8   :  { %v488_v5 = vpop.f32.mrb[6].mxu1 }
 0x3a9   :  { %v491_v6 = vmul.f32 0.01, %v486_v3  ;;  %v759_v7 = vpop.f32.mrb[7].mxu1 }
 0x3ab   :  { %v492_v8 = vmax.f32 %v486_v3, %v491_v6 }
 0x3ad   :  { %v493_v9 = vpack.c.bf16 %v492_v8, %v492_v8 }
 0x3af   :  { %777 = vmatmul.mubr.bf16.vlgmr.msra.gmra.mrb[8].mxu0 %v493_v9 }
 0x482   :  { %v599_v10 = vpop.f32.mrb[8].mxu0 }
 0x483   :  { %v600_v11 = vadd.f32 %v644_v0, %v599_v10  ;;  %v778_v12 = vpop.f32.mrb[9].mxu0 }
 0x484   :  { %v602_v13 = vpop.f32.mrb[10].mxu0 }
 0x485   :  { %606 = vst.msk [vmem:[%s1134_s11] sm:$0xff] %vm605_vm2, %v600_v11  ;;  %v779_v14 = vpop.f32.mrb[11].mxu0 }
 0x486   :  { %611 = vsyncpa [#allocation3], 1 }
 0x487   :  { %612 = vsyncpa [#allocation5], 1 }

</bundles_post_ra>
